<compile_context>
chip_gen: v7x
topology: tpu7x:2x2x1
jax: 0.10.0
libtpu: 0.0.40
codegen_flags: <defaults>
</compile_context>

<pallas_src>
import functools

import jax
import jax.numpy as jnp
from jax import lax
from jax.experimental import pallas as pl
from jax.experimental.pallas import tpu as pltpu


# ----------------------------------------------------------------------------
# Pallas kernel: full CONCURRENT resonator network (loop lives in the kernel)
# ----------------------------------------------------------------------------
def _resonator_kernel(x_ref, est0_ref, cb_ref, est_out_ref, iters_ref, conv_ref,
                      *, iterations):
    # x_ref:       (B, D)      bound input hypervector (f32)          [VMEM]
    # est0_ref:    (F, B, D)   initial factor estimates (+-1, f32)    [VMEM]
    # cb_ref:      (F, M, D)   stacked codebooks (+-1 / 0-pad, bf16)  [VMEM]
    # est_out_ref: (F, B, D)   final estimates (f32)                  [VMEM, out]
    # iters_ref:   (1,)        iterations executed                    [SMEM, out]
    # conv_ref:    (1,)        converged flag (0/1)                   [SMEM, out]
    x = x_ref[...]                                   # (B, D) f32
    cb_bf16 = cb_ref[...]                            # (F, M, D) bf16, exact +-1 / 0
    cb_f32 = cb_bf16.astype(jnp.float32)             # hoisted once (stage-2 operand)
    est0 = est0_ref[...].astype(jnp.float32)
    F = est0.shape[0]

    def one_stage(est):
        # Product over ALL factors; for bipolar +-1, prod_{j!=i} = prod_all * est_i.
        total = est[0]
        for j in range(1, F):                        # F is static -> unrolled
            total = total * est[j]                   # (B, D)
        xt = x * total                               # (B, D)  bind(input, prod_all)
        new_e = xt[None, :, :] * est                 # (F, B, D) = bind(input, inv_others)

        # dot_similarity, batched over F: (F,B,D) x (F,M,D) -> (F,B,M)   [MXU, bf16]
        # Operands are exactly +-1 (or 0 in padding), so bf16 is bit-exact; f32 acc.
        sim = lax.dot_general(
            new_e.astype(jnp.bfloat16), cb_bf16,
            dimension_numbers=(((2,), (2,)), ((0,), (0,))),
            preferred_element_type=jnp.float32,
        )
        # activation == 'NONE': similarity used as-is.

        # multiset (weighted bundle), batched over F: (F,B,M) x (F,M,D) -> (F,B,D)
        # `sim` holds integers up to +-D -> must stay f32 (bf16 would flip signs of
        # near-zero bundled values for D > 256).
        bundled = lax.dot_general(
            sim, cb_f32,
            dimension_numbers=(((2,), (1,)), ((0,), (0,))),
            preferred_element_type=jnp.float32,
        )
        # hard quantize back to bipolar +-1
        # TODO(synk): verify tie behavior (bundled == 0 -> +1) against the exact
        # VSA.quantize used by the PyTorch codebase (torch.sign maps 0 -> 0).
        return jnp.where(bundled >= 0, 1.0, -1.0).astype(jnp.float32)

    def cond(carry):
        _, it, done = carry
        return jnp.logical_and(it < iterations, done == 0)

    def body(carry):
        est, it, _ = carry
        new_est = one_stage(est)
        # inverse() is identity for bipolar vectors, so the two convergence checks
        # in the PyTorch code collapse to one.  Max-reduce is exact for any F,B,D.
        diff = jnp.max(jnp.abs(new_est - est))
        done = (diff == 0.0).astype(jnp.int32)
        return new_est, it + 1, done

    # TODO(synk): optionally amortize the while-cond gate by running K stages per
    # chunk (with per-stage predication to keep the exact iteration count); kept
    # per-iteration here to preserve the module's reported iteration semantics.
    est, it, done = lax.while_loop(
        cond, body, (est0, jnp.int32(0), jnp.int32(0))
    )

    est_out_ref[...] = est.astype(est_out_ref.dtype)
    iters_ref[0] = it
    conv_ref[0] = done


def _round_up(n, m):
    return ((n + m - 1) // m) * m


# ----------------------------------------------------------------------------
# Forward wrapper (padding / layout glue around the single kernel call)
# ----------------------------------------------------------------------------
@functools.partial(jax.jit, static_argnames=("iterations", "argmax_abs"))
def resonator_forward(x, init_estimates, codebooks, iterations=1000, argmax_abs=True):
    # known=None, codebooks=None-override, stoch='NONE' path of Resonator.forward
    # TODO(synk): THRESHOLD/SCALEDOWN activations, stoch noise and known-factor
    # substitution branches are not implemented (module config uses NONE/None).
    B, F, D = init_estimates.shape
    M = codebooks.shape[1]

    B_pad = _round_up(B, 8)       # sublane quantum for f32
    M_pad = _round_up(M, 128)     # lane quantum
    D_pad = _round_up(D, 128)
    # TODO(synk): for large batches, pad B toward 128/256 and add a batch grid with
    # dimension_semantics=("parallel",) (2 TCs on v7x); tiny B is latency-bound.

    x_p = x.astype(jnp.float32)
    cb_p = codebooks.astype(jnp.bfloat16)           # +-1 exact in bf16; halves VMEM/DMA
    est0 = jnp.transpose(init_estimates.astype(jnp.float32), (1, 0, 2))  # (F, B, D)

    # Pad batch by replicating row 0 -> padded rows follow the exact same
    # trajectory as a real row, so global convergence is unchanged.
    if B_pad != B:
        x_p = jnp.concatenate(
            [x_p, jnp.broadcast_to(x_p[:1], (B_pad - B, D))], axis=0)
        est0 = jnp.concatenate(
            [est0, jnp.broadcast_to(est0[:, :1, :], (F, B_pad - B, D))], axis=1)
    # Pad hypervector dim: zero lanes in input/codebooks, +1 lanes in estimates
    # (a stable fixed point -> no effect on similarities or convergence).
    if D_pad != D:
        x_p = jnp.pad(x_p, ((0, 0), (0, D_pad - D)))
        cb_p = jnp.pad(cb_p, ((0, 0), (0, 0), (0, D_pad - D)))
        est0 = jnp.pad(est0, ((0, 0), (0, 0), (0, D_pad - D)), constant_values=1.0)
    # Pad codebook size with zero codevectors (contribute nothing to sim/bundle).
    if M_pad != M:
        cb_p = jnp.pad(cb_p, ((0, 0), (0, M_pad - M), (0, 0)))

    # VMEM budget: bf16 cb + hoisted f32 cb + estimate carries/temps + sim + x + out.
    cb_bytes = F * M_pad * D_pad * (2 + 4)
    est_bytes = F * B_pad * D_pad * 4
    sim_bytes = F * B_pad * M_pad * 4
    x_bytes = B_pad * D_pad * 4
    need = cb_bytes + 6 * est_bytes + 2 * sim_bytes + 2 * x_bytes
    vmem_limit = int(min(64 * 1024 * 1024, max(2 * need, 8 * 1024 * 1024)))
    # TODO(synk): if bf16+f32 codebook copies exceed ~50 MiB (v7x), keep cb in HBM
    # (memory_space=pl.ANY) and double-buffer per-factor slices with
    # pltpu.make_async_copy inside the loop instead of holding it resident.

    kernel = functools.partial(_resonator_kernel, iterations=iterations)
    est_fbd, iters, conv = pl.pallas_call(
        kernel,
        out_shape=(
            jax.ShapeDtypeStruct((F, B_pad, D_pad), jnp.float32),
            jax.ShapeDtypeStruct((1,), jnp.int32),
            jax.ShapeDtypeStruct((1,), jnp.int32),
        ),
        in_specs=[
            pl.BlockSpec(memory_space=pltpu.MemorySpace.VMEM),
            pl.BlockSpec(memory_space=pltpu.MemorySpace.VMEM),
            pl.BlockSpec(memory_space=pltpu.MemorySpace.VMEM),
        ],
        out_specs=(
            pl.BlockSpec(memory_space=pltpu.MemorySpace.VMEM),
            pl.BlockSpec(memory_space=pltpu.MemorySpace.SMEM),
            pl.BlockSpec(memory_space=pltpu.MemorySpace.SMEM),
        ),
        compiler_params=pltpu.CompilerParams(vmem_limit_bytes=vmem_limit),
    )(x_p, est0, cb_p)

    est = jnp.transpose(est_fbd[:, :B, :D], (1, 0, 2)).astype(init_estimates.dtype)
    it = iters[0]
    converged = conv[0] > 0

    # cleanup: per-factor argmax of (|.| of) dot similarity — post-processing glue.
    sim = jnp.einsum("bfd,fmd->bfm", est.astype(jnp.float32),
                     codebooks.astype(jnp.float32))
    if argmax_abs:
        sim = jnp.abs(sim)
    outcome = jnp.argmax(sim, axis=-1)          # (B, F) codevector indices
    return outcome, est, it, converged


def get_init_estimates(codebooks, batch):
    # VSA.multiset(codebooks) then quantize, broadcast over batch
    bundled = jnp.sum(codebooks, axis=1)                         # (F, D)
    init = jnp.where(bundled >= 0, 1.0, -1.0).astype(codebooks.dtype)
    return jnp.broadcast_to(init[None], (batch,) + init.shape)   # (B, F, D)


# ----------------------------------------------------------------------------
# Pure-JAX reference (mirrors the PyTorch CONCURRENT path) for correctness check
# ----------------------------------------------------------------------------
def _stage_reference(x, est, cb):
    F = est.shape[1]
    rolled = [jnp.roll(est, i, axis=-2) for i in range(1, F)]
    inv_est = jnp.stack(rolled, axis=-2)                 # (B, F, F-1, D)
    inv_others = jnp.prod(inv_est, axis=-2)              # (B, F, D)
    new_e = x[:, None, :] * inv_others                   # (B, F, D)
    sim = jnp.einsum("bfd,fmd->bfm", new_e, cb)          # (B, F, M)
    bundled = jnp.einsum("bfm,fmd->bfd", sim, cb)        # (B, F, D)
    return jnp.where(bundled >= 0, 1.0, -1.0).astype(est.dtype)


def _reference_forward(x, init_estimates, codebooks, iterations, argmax_abs=True):
    est = init_estimates
    it = 0
    converged = False
    for k in range(iterations):
        new_est = _stage_reference(x, est, codebooks)
        it = k + 1
        same = bool(jnp.all(new_est == est))
        est = new_est
        if same:
            converged = True
            break
    sim = jnp.einsum("bfd,fmd->bfm", est, codebooks)
    if argmax_abs:
        sim = jnp.abs(sim)
    outcome = jnp.argmax(sim, axis=-1)
    return outcome, est, it, converged


if __name__ == "__main__":
    key = jax.random.PRNGKey(0)
    B, F, M, D = 2, 3, 8, 128   # batch, factors, codevectors/factor, hv dimension

    k_cb, k_idx = jax.random.split(key)
    # Bipolar codebooks in {-1, +1}
    codebooks = jnp.where(
        jax.random.uniform(k_cb, (F, M, D)) < 0.5, -1.0, 1.0
    ).astype(jnp.float32)

    # Input = bind (elementwise product) of one codevector per factor.
    true_idx = jax.random.randint(k_idx, (B, F), 0, M)
    selected = jnp.stack(
        [codebooks[f, true_idx[:, f], :] for f in range(F)], axis=1)  # (B, F, D)
    x = jnp.prod(selected, axis=1).astype(jnp.float32)                # (B, D)

    init_estimates = get_init_estimates(codebooks, B)                 # (B, F, D)

    # --- Pallas kernel forward (loop fused into one kernel) ------------------
    outcome_k, est_k, it_k, conv_k = resonator_forward(
        x, init_estimates, codebooks, iterations=100, argmax_abs=True)
    outcome_k, est_k, it_k, conv_k = jax.block_until_ready(
        (outcome_k, est_k, it_k, conv_k))

    # --- validate against the pure-JAX reference -----------------------------
    outcome_r, est_r, it_r, conv_r = _reference_forward(
        x, init_estimates, codebooks, iterations=100, argmax_abs=True)

    assert jnp.array_equal(est_k, est_r), "final estimates mismatch"
    assert int(it_k) == int(it_r), f"iteration count mismatch: {int(it_k)} vs {it_r}"
    assert bool(conv_k) == bool(conv_r), "converged flag mismatch"
    assert jnp.array_equal(outcome_k, outcome_r), "outcome mismatch"

    print("KERNEL_OK")
</pallas_src>

<mosaic_0001>
module attributes {stable_mosaic.version = 11 : i64} {
  func.func @_resonator_kernel(%arg0: memref<8x128xf32, #tpu.memory_space<vmem>>, %arg1: memref<3x8x128xf32, #tpu.memory_space<vmem>>, %arg2: memref<3x128x128xbf16, #tpu.memory_space<vmem>>, %arg3: memref<3x8x128xf32, #tpu.memory_space<vmem>>, %arg4: memref<1xi32, #tpu.memory_space<smem>>, %arg5: memref<1xi32, #tpu.memory_space<smem>>) attributes {dimension_semantics = [], scalar_prefetch = 0 : i64, scratch_operands = 0 : i64, tpu.core_type = #tpu.core_type<tc>} {
    %c0 = arith.constant 0 : index
    %c0_0 = arith.constant 0 : index
    %0 = vector.load %arg0[%c0, %c0_0] : memref<8x128xf32, #tpu.memory_space<vmem>>, vector<8x128xf32>
    %c0_1 = arith.constant 0 : index
    %c0_2 = arith.constant 0 : index
    %c0_3 = arith.constant 0 : index
    %1 = vector.load %arg2[%c0_1, %c0_2, %c0_3] : memref<3x128x128xbf16, #tpu.memory_space<vmem>>, vector<3x128x128xbf16>
    %2 = arith.extf %1 : vector<3x128x128xbf16> to vector<3x128x128xf32>
    %c0_4 = arith.constant 0 : index
    %c0_5 = arith.constant 0 : index
    %c0_6 = arith.constant 0 : index
    %3 = vector.load %arg1[%c0_4, %c0_5, %c0_6] : memref<3x8x128xf32, #tpu.memory_space<vmem>>, vector<3x8x128xf32>
    %c0_i32 = arith.constant 0 : i32
    %c0_i32_7 = arith.constant 0 : i32
    %4:3 = scf.while (%arg6 = %3, %arg7 = %c0_i32, %arg8 = %c0_i32_7) : (vector<3x8x128xf32>, i32, i32) -> (vector<3x8x128xf32>, i32, i32) {
      %c100_i32 = arith.constant 100 : i32
      %8 = arith.cmpi slt, %arg7, %c100_i32 : i32
      %c0_i32_13 = arith.constant 0 : i32
      %9 = arith.cmpi eq, %arg8, %c0_i32_13 : i32
      %10 = arith.andi %8, %9 : i1
      scf.condition(%10) %arg6, %arg7, %arg8 : vector<3x8x128xf32>, i32, i32
    } do {
    ^bb0(%arg6: vector<3x8x128xf32>, %arg7: i32, %arg8: i32):
      %8 = vector.extract_strided_slice %arg6 {offsets = [0, 0, 0], sizes = [1, 8, 128], strides = [1, 1, 1]} : vector<3x8x128xf32> to vector<1x8x128xf32>
      %9 = vector.shape_cast %8 : vector<1x8x128xf32> to vector<8x128xf32>
      %10 = vector.extract_strided_slice %arg6 {offsets = [1, 0, 0], sizes = [1, 8, 128], strides = [1, 1, 1]} : vector<3x8x128xf32> to vector<1x8x128xf32>
      %11 = vector.shape_cast %10 : vector<1x8x128xf32> to vector<8x128xf32>
      %12 = arith.mulf %9, %11 : vector<8x128xf32>
      %13 = vector.extract_strided_slice %arg6 {offsets = [2, 0, 0], sizes = [1, 8, 128], strides = [1, 1, 1]} : vector<3x8x128xf32> to vector<1x8x128xf32>
      %14 = vector.shape_cast %13 : vector<1x8x128xf32> to vector<8x128xf32>
      %15 = arith.mulf %12, %14 : vector<8x128xf32>
      %16 = arith.mulf %0, %15 : vector<8x128xf32>
      %17 = vector.shape_cast %16 : vector<8x128xf32> to vector<1x8x128xf32>
      %18 = vector.broadcast %17 : vector<1x8x128xf32> to vector<3x8x128xf32>
      %19 = arith.mulf %18, %arg6 : vector<3x8x128xf32>
      %20 = arith.truncf %19 : vector<3x8x128xf32> to vector<3x8x128xbf16>
      %cst = arith.constant dense<0.000000e+00> : vector<3x8x128xf32>
      %21 = tpu.matmul %20, %1, %cst {dimension_numbers = #tpu.dot_dimension_numbers<[2], [2], [1], [1], [0, 0, 0, 1, 1, 1], [0], [0]>} : vector<3x8x128xbf16>, vector<3x128x128xbf16>, vector<3x8x128xf32> -> vector<3x8x128xf32>
      %cst_13 = arith.constant dense<0.000000e+00> : vector<3x8x128xf32>
      %22 = tpu.matmul %21, %2, %cst_13 {dimension_numbers = #tpu.dot_dimension_numbers<[2], [1], [1], [2], [0, 0, 0, 1, 1, 2], [0], [0]>} : vector<3x8x128xf32>, vector<3x128x128xf32>, vector<3x8x128xf32> -> vector<3x8x128xf32>
      %cst_14 = arith.constant 0.000000e+00 : f32
      %23 = vector.broadcast %cst_14 : f32 to vector<3x8x128xf32>
      %24 = arith.cmpf oge, %22, %23 : vector<3x8x128xf32>
      %cst_15 = arith.constant 1.000000e+00 : f32
      %cst_16 = arith.constant -1.000000e+00 : f32
      %25 = vector.broadcast %cst_15 : f32 to vector<3x8x128xf32>
      %26 = vector.broadcast %cst_16 : f32 to vector<3x8x128xf32>
      %27 = arith.select %24, %25, %26 : vector<3x8x128xi1>, vector<3x8x128xf32>
      %28 = arith.subf %27, %arg6 : vector<3x8x128xf32>
      %29 = math.absf %28 : vector<3x8x128xf32>
      %30 = vector.shape_cast %29 : vector<3x8x128xf32> to vector<1x3x8x128xf32>
      %cst_17 = arith.constant dense<0xFF800000> : vector<1xf32>
      %31 = vector.multi_reduction <maximumf>, %30, %cst_17 [1, 2, 3] : vector<1x3x8x128xf32> to vector<1xf32>
      %32 = vector.shape_cast %31 : vector<1xf32> to vector<1x1x1x1xf32>
      %33 = vector.extract %32[0, 0, 0, 0] : f32 from vector<1x1x1x1xf32>
      %cst_18 = arith.constant 0.000000e+00 : f32
      %34 = arith.cmpf oeq, %33, %cst_18 : f32
      %35 = arith.extui %34 : i1 to i32
      %c1_i32 = arith.constant 1 : i32
      %36 = arith.addi %arg7, %c1_i32 : i32
      scf.yield %27, %36, %35 : vector<3x8x128xf32>, i32, i32
    }
    %c0_8 = arith.constant 0 : index
    %c0_9 = arith.constant 0 : index
    %c0_10 = arith.constant 0 : index
    %5 = vector.load %arg3[%c0_8, %c0_9, %c0_10] : memref<3x8x128xf32, #tpu.memory_space<vmem>>, vector<3x8x128xf32>
    tpu.vector_store %arg3[%c0_8, %c0_9, %c0_10], %4#0 {strides = array<i32>} : memref<3x8x128xf32, #tpu.memory_space<vmem>>, vector<3x8x128xf32>,
    %c0_11 = arith.constant 0 : index
    %6 = memref.load %arg4[%c0_11] : memref<1xi32, #tpu.memory_space<smem>>
    memref.store %4#1, %arg4[%c0_11] : memref<1xi32, #tpu.memory_space<smem>>
    %c0_12 = arith.constant 0 : index
    %7 = memref.load %arg5[%c0_12] : memref<1xi32, #tpu.memory_space<smem>>
    memref.store %4#2, %arg5[%c0_12] : memref<1xi32, #tpu.memory_space<smem>>
    return
  }
}

</mosaic_0001>

<bundles_post_ra>
// kernel: resonator_forward.1
= control target key start
LH: loop header
LB: loop body
LE: loop exit
PB: predicated region body
PF: predicated region fallthrough
CT: control target
= control target key end

     0   :  { %11 = vsyncpa [#allocation3], 0  ;;  %s1661_s0 = inlined_call_operand.vmem [shape: f32[8,128], index: 0, kind: input, shape index: {}]   ;;  %s1662_s1 = inlined_call_operand.vmem [shape: f32[3,8,128], index: 1, kind: input, shape index: {}]   ;;  %s1663_s2 = inlined_call_operand.vmem [shape: bf16[3,128,128], index: 2, kind: input, shape index: {}]   ;;  %s1664_s3 = inlined_call_operand.vmem [shape: f32[3,8,128], index: 3, kind: output, shape index: {0}]   ;;  %s1665_s4 = inlined_call_operand.hbm [shape: s32[1], index: 4, kind: output, shape index: {1}]   ;;  %s1666_s5 = inlined_call_operand.hbm [shape: s32[1], index: 5, kind: output, shape index: {2}]  }
   0x1   :  { %12 = vsyncpa [#allocation5], 0  ;;  %v1194_v0 = vld [vmem:[%s1661_s0] sm:$0xff]  ;;  %v1209_v3 = vld [vmem:[%s1663_s2 + $0x8] sm:$0xf]  ;;  %s1445_s18 = smov 0  }
   0x2   :  { %1667 = vst [vmem:[#allocation8_spill] sm:$0xff] %v1194_v0  ;;  %v1199_v1 = vld [vmem:[%s1663_s2] sm:$0xf]  ;;  %v1204_v2 = vld [vmem:[%s1663_s2 + $0x4] sm:$0xf]  ;;  %1670 = vst [vmem:[#allocation11_spill] sm:$0xff] %v1209_v3 }
   0x3   :  { %1668 = vst [vmem:[#allocation9_spill] sm:$0xff] %v1199_v1  ;;  %1669 = vst [vmem:[#allocation10_spill] sm:$0xff] %v1204_v2  ;;  %v1214_v4 = vld [vmem:[%s1663_s2 + $0xc] sm:$0xf]  ;;  %v1219_v5 = vld [vmem:[%s1663_s2 + $0x10] sm:$0xf] }
   0x4   :  { %1671 = vst [vmem:[#allocation12_spill] sm:$0xff] %v1214_v4  ;;  %1672 = vst [vmem:[#allocation13_spill] sm:$0xff] %v1219_v5  ;;  %v1224_v6 = vld [vmem:[%s1663_s2 + $0x14] sm:$0xf]  ;;  %v1229_v7 = vld [vmem:[%s1663_s2 + $0x18] sm:$0xf] }
   0x5   :  { %1673 = vst [vmem:[#allocation14_spill] sm:$0xff] %v1224_v6  ;;  %1674 = vst [vmem:[#allocation15_spill] sm:$0xff] %v1229_v7  ;;  %v1234_v8 = vld [vmem:[%s1663_s2 + $0x1c] sm:$0xf]  ;;  %v1239_v9 = vld [vmem:[%s1663_s2 + $0x20] sm:$0xf] }
   0x6   :  { %1675 = vst [vmem:[#allocation16_spill] sm:$0xff] %v1234_v8  ;;  %1676 = vst [vmem:[#allocation17_spill] sm:$0xff] %v1239_v9  ;;  %v1244_v10 = vld [vmem:[%s1663_s2 + $0x24] sm:$0xf]  ;;  %v1249_v11 = vld [vmem:[%s1663_s2 + $0x28] sm:$0xf] }
   0x7   :  { %1677 = vst [vmem:[#allocation18_spill] sm:$0xff] %v1244_v10  ;;  %1678 = vst [vmem:[#allocation19_spill] sm:$0xff] %v1249_v11  ;;  %v1254_v12 = vld [vmem:[%s1663_s2 + $0x2c] sm:$0xf]  ;;  %v1259_v13 = vld [vmem:[%s1663_s2 + $0x30] sm:$0xf] }
   0x8   :  { %v1264_v14 = vld [vmem:[%s1663_s2 + $0x34] sm:$0xf]  ;;  %v1269_v15 = vld [vmem:[%s1663_s2 + $0x38] sm:$0xf]  ;;  %v1274_v16 = vld [vmem:[%s1663_s2 + $0x3c] sm:$0xf] }
   0x9   :  { %v1279_v17 = vld [vmem:[%s1663_s2 + $0x40] sm:$0xf]  ;;  %v1284_v18 = vld [vmem:[%s1663_s2 + $0x44] sm:$0xf]  ;;  %v1289_v19 = vld [vmem:[%s1663_s2 + $0x48] sm:$0xf] }
   0xa   :  { %v1294_v20 = vld [vmem:[%s1663_s2 + $0x4c] sm:$0xf]  ;;  %v1299_v21 = vld [vmem:[%s1663_s2 + $0x50] sm:$0xf]  ;;  %v1304_v22 = vld [vmem:[%s1663_s2 + $0x54] sm:$0xf] }
   0xb   :  { %v1309_v23 = vld [vmem:[%s1663_s2 + $0x58] sm:$0xf]  ;;  %v1314_v24 = vld [vmem:[%s1663_s2 + $0x5c] sm:$0xf]  ;;  %v1319_v25 = vld [vmem:[%s1663_s2 + $0x60] sm:$0xf] }
   0xc   :  { %v1324_v26 = vld [vmem:[%s1663_s2 + $0x64] sm:$0xf]  ;;  %v1329_v27 = vld [vmem:[%s1663_s2 + $0x68] sm:$0xf]  ;;  %v1334_v28 = vld [vmem:[%s1663_s2 + $0x6c] sm:$0xf] }
   0xd   :  { %v1339_v29 = vld [vmem:[%s1663_s2 + $0x70] sm:$0xf]  ;;  %v1344_v30 = vld [vmem:[%s1663_s2 + $0x74] sm:$0xf]  ;;  %v1349_v31 = vld [vmem:[%s1663_s2 + $0x78] sm:$0xf] }
   0xe   :  { %v1354_v32 = vld [vmem:[%s1663_s2 + $0x7c] sm:$0xf]  ;;  %v1359_v33 = vld [vmem:[%s1663_s2 + $0x80] sm:$0xf]  ;;  %v1364_v34 = vld [vmem:[%s1663_s2 + $0x84] sm:$0xf] }
   0xf   :  { %v1369_v35 = vld [vmem:[%s1663_s2 + $0x88] sm:$0xf]  ;;  %v1374_v36 = vld [vmem:[%s1663_s2 + $0x8c] sm:$0xf]  ;;  %v1379_v37 = vld [vmem:[%s1663_s2 + $0x90] sm:$0xf] }
  0x10   :  { %v1384_v38 = vld [vmem:[%s1663_s2 + $0x94] sm:$0xf]  ;;  %v1389_v39 = vld [vmem:[%s1663_s2 + $0x98] sm:$0xf]  ;;  %v1394_v40 = vld [vmem:[%s1663_s2 + $0x9c] sm:$0xf] }
  0x11   :  { %v1399_v41 = vld [vmem:[%s1663_s2 + $0xa0] sm:$0xf]  ;;  %v1404_v42 = vld [vmem:[%s1663_s2 + $0xa4] sm:$0xf]  ;;  %v1409_v43 = vld [vmem:[%s1663_s2 + $0xa8] sm:$0xf] }
  0x12   :  { %v1414_v44 = vld [vmem:[%s1663_s2 + $0xac] sm:$0xf]  ;;  %v1419_v45 = vld [vmem:[%s1663_s2 + $0xb0] sm:$0xf]  ;;  %v1424_v46 = vld [vmem:[%s1663_s2 + $0xb4] sm:$0xf] }
  0x13   :  { %v1429_v47 = vld [vmem:[%s1663_s2 + $0xb8] sm:$0xf]  ;;  %v1434_v48 = vld [vmem:[%s1663_s2 + $0xbc] sm:$0xf]  ;;  %v117_v49 = vld [vmem:[%s1662_s1] sm:$0xff]  }
  0x14   :  { %v118_v50 = vld [vmem:[%s1662_s1 + $0x8] sm:$0xff]   ;;  %v119_v51 = vld [vmem:[%s1662_s1 + $0x10] sm:$0xff]  }
  0x15 LB: > { %v1679_v2 = vld [vmem:[#allocation10_spill] sm:$0xff]  ;;  %v1680_v1 = vld [vmem:[#allocation9_spill] sm:$0xff]  ;;  %v1155_v53 = vmov 0.0   ;;  %v1473_v54 = vcombine.low %v1279_v17, %v1284_v18  ;;  %vm1156_vm0 = vmmov 0   ;;  %v1681_v4 = vld [vmem:[#allocation12_spill] sm:$0xff]  ;;  %v1487_v56 = vcombine.low %v1289_v19, %v1294_v20  ;;  %s640_s1 = sadd.s32 1, %s1141_s18   ;;  %v1153_v49 = vphi %v117_v49, %v1694_v49   ;;  %v1149_v50 = vphi %v118_v50, %v1693_v50   ;;  %v1145_v51 = vphi %v119_v51, %v1692_v51   ;;  %s1141_s18 = sphi %s1445_s18, %s1691_s18  }
  0x16   : > { %v1467_v52 = vcombine.low %v1680_v1, %v1679_v2  ;;  %798 = vmatprep.subr.bf16.mxu0 %v1155_v53  ;;  %818 = vmatprep.subr.bf16.mxu1 %v1155_v53  ;;  %v1682_v3 = vld [vmem:[#allocation11_spill] sm:$0xff]  ;;  %v1683_v6 = vld [vmem:[#allocation14_spill] sm:$0xff]  ;;  %v1684_v5 = vld [vmem:[#allocation13_spill] sm:$0xff]  ;;  %v1496_v58 = vcombine.low %v1299_v21, %v1304_v22  ;;  %v1505_v60 = vcombine.low %v1309_v23, %v1314_v24  ;;  %p126_p1 = scmp.lt.s32.totalorder %s640_s1, 100  ;;  %s1691_s18 = smov %s640_s1 }
  0x17   : > { %819 = vmatpush3.bf16.xpose.msra.mxu1 %v1473_v54  ;;  %814 = vmatprep.mubr.msk.bf16.mxu0 %vm1156_vm0, %v1155_v53  ;;  %v697_v55 = vcombine.low %v1682_v3, %v1681_v4  ;;  %v698_v57 = vcombine.low %v1684_v5, %v1683_v6  ;;  %v1685_v8 = vld [vmem:[#allocation16_spill] sm:$0xff]  ;;  %v1686_v7 = vld [vmem:[#allocation15_spill] sm:$0xff]  ;;  %v1687_v10 = vld [vmem:[#allocation18_spill] sm:$0xff]  ;;  %v1514_v62 = vcombine.low %v1319_v25, %v1324_v26 }
  0x18   : > { %799 = vmatpush3.bf16.xpose.msra.mxu0 %v1467_v52  ;;  %820 = vmatprep.subr.bf16.mxu1 %v1155_v53  ;;  %v699_v59 = vcombine.low %v1686_v7, %v1685_v8  ;;  %v1688_v9 = vld [vmem:[#allocation17_spill] sm:$0xff]  ;;  %v1689_v11 = vld [vmem:[#allocation19_spill] sm:$0xff]  ;;  %v1523_v1 = vcombine.low %v1329_v27, %v1334_v28  ;;  %v132_v2 = vmul.f32 %v1149_v50, %v1153_v49  ;;  %v1690_v0 = vld [vmem:[#allocation8_spill] sm:$0xff] }
  0x19   : > { %800 = vmatprep.subr.bf16.mxu0 %v1155_v53  ;;  %834 = vmatprep.mubr.msk.bf16.mxu1 %vm1156_vm0, %v1155_v53  ;;  %v700_v61 = vcombine.low %v1688_v9, %v1687_v10  ;;  %v701_v63 = vcombine.low %v1689_v11, %v1254_v12  ;;  %v702_v3 = vcombine.low %v1259_v13, %v1264_v14  ;;  %v1157_v10 = vmov 0.0|0.0  }
  0x1a   : > { %v1534_v4 = vcombine.low %v1339_v29, %v1344_v30  ;;  %v133_v5 = vmul.f32 %v1145_v51, %v132_v2  ;;  %v703_v7 = vcombine.low %v1269_v15, %v1274_v16  ;;  %v1545_v8 = vcombine.low %v1349_v31, %v1354_v32 }
  0x1c   : > { %v134_v6 = vmul.f32 %v133_v5, %v1690_v0  ;;  %v712_v0 = vcombine.low %v1359_v33, %v1364_v34 }
  0x1e   : > { %v135_v9 = vmul.f32 %v1153_v49, %v134_v6  ;;  %v136_v2 = vmul.f32 %v1149_v50, %v134_v6 }
  0x1f   : > { %821 = vmatpush3.bf16.xpose.msra.mxu1 %v1487_v56 }
  0x20   : > { %801 = vmatpush3.bf16.xpose.msra.mxu0 %v697_v55  ;;  %822 = vmatprep.subr.bf16.mxu1 %v1155_v53  ;;  %v138_v5 = vpack.c.bf16 %v135_v9, %v135_v9  ;;  %v139_v11 = vpack.c.bf16 %v136_v2, %v136_v2  ;;  %v713_v9 = vcombine.low %v1369_v35, %v1374_v36 }
  0x21   : > { %802 = vmatprep.subr.bf16.mxu0 %v1155_v53 }
  0x27   : > { %823 = vmatpush3.bf16.xpose.msra.mxu1 %v1496_v58 }
  0x28   : > { %803 = vmatpush3.bf16.xpose.msra.mxu0 %v698_v57  ;;  %824 = vmatprep.subr.bf16.mxu1 %v1155_v53 }
  0x29   : > { %804 = vmatprep.subr.bf16.mxu0 %v1155_v53 }
  0x2f   : > { %825 = vmatpush3.bf16.xpose.msra.mxu1 %v1505_v60 }
  0x30   : > { %805 = vmatpush3.bf16.xpose.msra.mxu0 %v699_v59  ;;  %826 = vmatprep.subr.bf16.mxu1 %v1155_v53 }
  0x31   : > { %806 = vmatprep.subr.bf16.mxu0 %v1155_v53 }
  0x37   : > { %827 = vmatpush3.bf16.xpose.msra.mxu1 %v1514_v62 }
  0x38   : > { %807 = vmatpush3.bf16.xpose.msra.mxu0 %v700_v61  ;;  %828 = vmatprep.subr.bf16.mxu1 %v1155_v53 }
  0x39   : > { %808 = vmatprep.subr.bf16.mxu0 %v1155_v53 }
  0x3f   : > { %829 = vmatpush3.bf16.xpose.msra.mxu1 %v1523_v1 }
  0x40   : > { %809 = vmatpush3.bf16.xpose.msra.mxu0 %v701_v63  ;;  %830 = vmatprep.subr.bf16.mxu1 %v1155_v53 }
  0x41   : > { %810 = vmatprep.subr.bf16.mxu0 %v1155_v53 }
  0x47   : > { %831 = vmatpush3.bf16.xpose.msra.mxu1 %v1534_v4 }
  0x48   : > { %811 = vmatpush3.bf16.xpose.msra.mxu0 %v702_v3  ;;  %832 = vmatprep.subr.bf16.mxu1 %v1155_v53 }
  0x49   : > { %812 = vmatprep.subr.bf16.mxu0 %v1155_v53 }
  0x4f   : > { %833 = vmatpush3.bf16.xpose.msra.mxu1 %v1545_v8 }
  0x50   : > { %813 = vmatpush3.bf16.xpose.msra.mxu0 %v703_v7  ;;  %963 = vmatprep.subr.bf16.mxu1 %v1157_v10 }
  0x51   : > { %838 = vmatprep.subr.bf16.mxu0 %v1155_v53 }
  0x56   : > { %835 = vmatmul.mubr.bf16.vlgmr.msra.gmra.mrb[0].mxu1 %v139_v11  ;;  %v714_v11 = vcombine.low %v1379_v37, %v1384_v38 }
  0x57   : > { %815 = vmatmul.mubr.bf16.vlgmr.msra.gmra.mrb[0].mxu0 %v138_v5  ;;  %965 = vmatpush3.bf16.msra.mxu1 %v1467_v52  ;;  %v715_v52 = vcombine.low %v1389_v39, %v1394_v40 }
  0x58   : > { %839 = vmatpush3.bf16.xpose.msra.mxu0 %v712_v0  ;;  %854 = vmatprep.mubr.msk.bf16.mxu0 %vm1156_vm0, %v1155_v53 }
  0x59   : > { %840 = vmatprep.subr.bf16.mxu0 %v1155_v53  ;;  %890 = vmatprep.mubr.msk.f32.mxu1 %vm1156_vm0, %v1155_v53 }
  0x5a   : > { %966 = vmatprep.subr.bf16.mxu1 %v1157_v10 }
  0x5b   : > { %968 = vmatpush3.bf16.msra.mxu1 %v697_v55  ;;  %v716_v55 = vcombine.low %v1399_v41, %v1404_v42 }
  0x5c   : > { %969 = vmatprep.subr.bf16.mxu1 %v1157_v10 }
  0x5f   : > { %971 = vmatpush3.bf16.msra.mxu1 %v698_v57  ;;  %v717_v57 = vcombine.low %v1409_v43, %v1414_v44 }
  0x60   : > { %841 = vmatpush3.bf16.xpose.msra.mxu0 %v713_v9  ;;  %972 = vmatprep.subr.bf16.mxu1 %v1157_v10 }
  0x61   : > { %842 = vmatprep.subr.bf16.mxu0 %v1155_v53 }
  0x63   : > { %974 = vmatpush3.bf16.msra.mxu1 %v699_v59  ;;  %v137_v59 = vmul.f32 %v1145_v51, %v134_v6 }
  0x64   : > { %975 = vmatprep.subr.bf16.mxu1 %v1157_v10 }
  0x67   : > { %977 = vmatpush3.bf16.msra.mxu1 %v700_v61  ;;  %v140_v61 = vpack.c.bf16 %v137_v59, %v137_v59 }
  0x68   : > { %843 = vmatpush3.bf16.xpose.msra.mxu0 %v714_v11  ;;  %978 = vmatprep.subr.bf16.mxu1 %v1157_v10 }
  0x69   : > { %844 = vmatprep.subr.bf16.mxu0 %v1155_v53 }
  0x6b   : > { %980 = vmatpush3.bf16.msra.mxu1 %v701_v63 }
  0x6c   : > { %981 = vmatprep.subr.bf16.mxu1 %v1157_v10 }
  0x6f   : > { %983 = vmatpush3.bf16.msra.mxu1 %v702_v3  ;;  %v718_v3 = vcombine.low %v1419_v45, %v1424_v46 }
  0x70   : > { %845 = vmatpush3.bf16.xpose.msra.mxu0 %v715_v52  ;;  %984 = vmatprep.subr.bf16.mxu1 %v1157_v10 }
  0x71   : > { %846 = vmatprep.subr.bf16.mxu0 %v1155_v53 }
  0x73   : > { %986 = vmatpush3.bf16.msra.mxu1 %v703_v7  ;;  %v719_v7 = vcombine.low %v1429_v47, %v1434_v48 }
  0x74   : > { %987 = vmatprep.subr.bf16.mxu1 %v1157_v10 }
  0x78   : > { %847 = vmatpush3.bf16.xpose.msra.mxu0 %v716_v55 }
  0x79   : > { %848 = vmatprep.subr.bf16.mxu0 %v1155_v53 }
  0x80   : > { %849 = vmatpush3.bf16.xpose.msra.mxu0 %v717_v57 }
  0x81   : > { %850 = vmatprep.subr.bf16.mxu0 %v1155_v53 }
  0x88   : > { %851 = vmatpush3.bf16.xpose.msra.mxu0 %v718_v3 }
  0x89   : > { %852 = vmatprep.subr.bf16.mxu0 %v1155_v53 }
  0x90   : > { %853 = vmatpush3.bf16.xpose.msra.mxu0 %v719_v7 }
  0x91   : > { %1011 = vmatprep.subr.bf16.mxu0 %v1157_v10 }
  0x97   : > { %855 = vmatmul.mubr.bf16.vlgmr.msra.gmra.mrb[4].mxu0 %v140_v61 }
  0x98   : > { %1013 = vmatpush3.bf16.msra.mxu0 %v712_v0  ;;  %960 = vmatprep.mubr.msk.f32.mxu0 %vm1156_vm0, %v1155_v53 }
  0x99   : > { %1014 = vmatprep.subr.bf16.mxu0 %v1157_v10 }
  0x9c   : > { %1016 = vmatpush3.bf16.msra.mxu0 %v713_v9 }
  0x9d   : > { %1017 = vmatprep.subr.bf16.mxu0 %v1157_v10 }
  0xa0   : > { %1019 = vmatpush3.bf16.msra.mxu0 %v714_v11 }
  0xa1   : > { %1020 = vmatprep.subr.bf16.mxu0 %v1157_v10 }
  0xa4   : > { %1022 = vmatpush3.bf16.msra.mxu0 %v715_v52 }
  0xa5   : > { %1023 = vmatprep.subr.bf16.mxu0 %v1157_v10 }
  0xa8   : > { %1025 = vmatpush3.bf16.msra.mxu0 %v716_v55  ;;  %v1158_v55 = vmov -1.0  }
  0xa9   : > { %1026 = vmatprep.subr.bf16.mxu0 %v1157_v10 }
  0xac   : > { %1028 = vmatpush3.bf16.msra.mxu0 %v717_v57 }
  0xad   : > { %1029 = vmatprep.subr.bf16.mxu0 %v1157_v10 }
  0xb0   : > { %1031 = vmatpush3.bf16.msra.mxu0 %v718_v3 }
  0xb1   : > { %1032 = vmatprep.subr.bf16.mxu0 %v1157_v10 }
  0xb4   : > { %1034 = vmatpush3.bf16.msra.mxu0 %v719_v7 }
 0x129   : > { %v311_v63 = vpop.f32.mrb[0].mxu1 }
 0x12a   : > { %v223_v0 = vpop.f32.mrb[0].mxu0  ;;  %v836_v5 = vpop.f32.mrb[1].mxu1 }
 0x12b   : > { %v816_v6 = vpop.f32.mrb[1].mxu0  ;;  %891 = vmatmul.mubr.f32.vlgmr.msra.gmra.mrb[4].mxu1 %v223_v0  ;;  %v314_v11 = vpop.f32.mrb[2].mxu1 }
 0x12c   : > { %989 = vmatpush3.bf16.msra.mxu1 %v1473_v54  ;;  %v226_v2 = vpop.f32.mrb[2].mxu0  ;;  %925 = vmatprep.mubr.msk.f32.mxu1 %vm1156_vm0, %v1155_v53  ;;  %v837_v52 = vpop.f32.mrb[3].mxu1 }
 0x12d   : > { %v817_v9 = vpop.f32.mrb[3].mxu0  ;;  %990 = vmatprep.subr.bf16.mxu1 %v1157_v10 }
 0x130   : > { %992 = vmatpush3.bf16.msra.mxu1 %v1487_v56 }
 0x131   : > { %993 = vmatprep.subr.bf16.mxu1 %v1157_v10 }
 0x134   : > { %995 = vmatpush3.bf16.msra.mxu1 %v1496_v58 }
 0x135   : > { %996 = vmatprep.subr.bf16.mxu1 %v1157_v10 }
 0x138   : > { %998 = vmatpush3.bf16.msra.mxu1 %v1505_v60 }
 0x139   : > { %999 = vmatprep.subr.bf16.mxu1 %v1157_v10 }
 0x13c   : > { %1001 = vmatpush3.bf16.msra.mxu1 %v1514_v62 }
 0x13d   : > { %1002 = vmatprep.subr.bf16.mxu1 %v1157_v10 }
 0x140   : > { %1004 = vmatpush3.bf16.msra.mxu1 %v1523_v1 }
 0x141   : > { %1005 = vmatprep.subr.bf16.mxu1 %v1157_v10 }
 0x144   : > { %1007 = vmatpush3.bf16.msra.mxu1 %v1534_v4 }
 0x145   : > { %1008 = vmatprep.subr.bf16.mxu1 %v1157_v10 }
 0x148   : > { %1010 = vmatpush3.bf16.msra.mxu1 %v1545_v8 }
 0x14b   : > { %926 = vmatmul.mubr.f32.vlgmr.msra.gmra.mrb[6].mxu1 %v311_v63 }
 0x16a   : > { %v399_v53 = vpop.f32.mrb[4].mxu0 }
 0x16b   : > { %v856_v54 = vpop.f32.mrb[5].mxu0  ;;  %961 = vmatmul.mubr.f32.vlgmr.msra.gmra.mrb[8].mxu0 %v399_v53 }
 0x16c   : > { %v402_v56 = vpop.f32.mrb[6].mxu0 }
 0x16d   : > { %v857_v58 = vpop.f32.mrb[7].mxu0 }
 0x1fe   : > { %v471_v60 = vpop.f32.mrb[4].mxu1 }
 0x1ff   : > { %v892_v62 = vpop.f32.mrb[5].mxu1  ;;  %vm615_vm1 = vcmp.ge.f32.partialorder %v471_v60, 0.0 }
 0x200   : > { %v618_v57 = vsel %vm615_vm1, 1.0, %v1158_v55  }
 0x201   : > { %v621_v3 = vsub.f32 %v618_v57, %v1153_v49 }
 0x203   : > { %v624_v7 = vand.u32 2147483647, %v621_v3 }
 0x21e   : > { %v541_v1 = vpop.f32.mrb[6].mxu1 }
 0x21f   : > { %vm616_vm2 = vcmp.ge.f32.partialorder %v541_v1, 0.0  ;;  %v927_v4 = vpop.f32.mrb[7].mxu1 }
 0x220   : > { %v619_v10 = vsel %vm616_vm2, 1.0, %v1158_v55  }
 0x221   : > { %v622_v8 = vsub.f32 %v619_v10, %v1149_v50 }
 0x223   : > { %v625_v59 = vand.u32 2147483647, %v622_v8 }
 0x225   : > { %v627_v61 = vmax.f32.f32 %v624_v7, %v625_v59 }
 0x23e   : > { %v611_v0 = vpop.f32.mrb[8].mxu0 }
 0x23f   : > { %vm617_vm3 = vcmp.ge.f32.partialorder %v611_v0, 0.0  ;;  %v962_v6 = vpop.f32.mrb[9].mxu0 }
 0x240   : > { %v620_v63 = vsel %vm617_vm3, 1.0, %v1158_v55  }
 0x241   : > { %v623_v2 = vsub.f32 %v620_v63, %v1145_v51  ;;  %v1692_v51 = vmov %v620_v63 }
 0x243   : > { %v626_v5 = vand.u32 2147483647, %v623_v2 }
 0x245   : > { %v628_v9 = vmax.f32.f32 %v627_v61, %v626_v5 }
 0x247   : > { %629 = vmax.xlane.f32.xlu0 %v628_v9 }
 0x2d4   : > { %v630_v49 = vpop.xlane.xlu0 %629 }
 0x2d5   : > { %v631_v11 = vrot.slane %v630_v49, 4 }
 0x2d7   : > { %v632_v52 = vmax.f32 %v630_v49, %v631_v11  ;;  %v1694_v49 = vmov %v618_v57 }
 0x2d9   : > { %v633_v53 = vrot.slane %v632_v52, 2 }
 0x2db   : > { %v634_v54 = vmax.f32 %v632_v52, %v633_v53 }
 0x2dd   : > { %v635_v56 = vrot.slane %v634_v54, 1 }
 0x2df   : > { %v636_v50 = vmax.f32 %v634_v54, %v635_v56 }
 0x2e1   : > { %1059 = vpush %v636_v50  ;;  %v1693_v50 = vmov %v619_v10 }
 0x312   : > { %s1060_s2 = spop %1059 }
 0x313   : > { %p638_p0 = scmp.eq.f32.partialorder %s1060_s2, 0.0 }
 0x315   : > { %s639_s19 = scalar_select %p638_p0, 1, 0 }
 0x317   : > { %p127_p2 = scmp.eq.s32.totalorder %s639_s19, 0 }
 0x319   : > { %p128_p3 = pnand %p127_p2, %p126_p1 }
 0x31a   :  { %641 = vst [vmem:[%s1664_s3] sm:$0xff] (%p128_p3), %v618_v57  ;;  %642 = vst [vmem:[%s1664_s3 + $0x8] sm:$0xff] (%p128_p3), %v619_v10  ;;  %645 = sst [smem:[#allocation2]] (%p128_p3), %s640_s1  ;;  %s1099_s0 = scalar_lea.hbm (%p128_p3), %s1665_s4, 16 }
 0x31b   :  { %131 = sbr.rel (!%p128_p3) target bundleno = 21 (0x15), region = 57  ;;  %643 = vst [vmem:[%s1664_s3 + $0x10] sm:$0xff] (%p128_p3), %v620_v63  ;;  %p1100_p4 = scmp.ne.s32.totalorder (%p128_p3), %s1665_s4, %s1099_s0 }
 0x31c   :  { %p1103_p5 = scmp.lt.u32.totalorder (%p128_p3), %s1099_s0, %s1665_s4 }
 0x31e   :  { %p1105_p6 = pnand (%p128_p3), %p1103_p5, %p1100_p4 }
 0x322   :  { %1108 = shalt.err (!%p1105_p6)
}
 0x323   :  { %s1159_s7 = smov [#allocation2]   ;;  %647 = sst [smem:[#allocation4]] %s639_s19 }
 0x324   :  { %657 = dma.smem_to_hbm %s1159_s7, 16, %s1665_s4, [#allocation3]  }
 0x325   :  { %s1109_s11 = scalar_lea.hbm %s1666_s5, 16 }
 0x326   :  { %p1110_p7 = scmp.ne.s32.totalorder %s1666_s5, %s1109_s11  ;;  %p1113_p8 = scmp.lt.u32.totalorder %s1109_s11, %s1666_s5 }
 0x328   :  { %p1115_p9 = pnand %p1113_p8, %p1110_p7 }
 0x32a   :  { %1118 = shalt.err (!%p1115_p9)
}
 0x32b   :  { %s1160_s16 = smov [#allocation4]  }
 0x32c   :  { %665 = dma.smem_to_hbm %s1160_s16, 16, %s1666_s5, [#allocation5]  }
 0x32d   :  { %1135 = dma.done.wait [#allocation3], 16  }
 0x32e   :  { %1136 = vsyncadd [#allocation3], 4294967280 }
 0x32f   :  { %1137 = dma.done.wait [#allocation5], 16  }
 0x330   :  { %1138 = vsyncadd [#allocation5], 4294967280 }
 0x331   :  { %674 = sfence }
 0x332   :  { %675 = vsyncpa [#allocation3], 1 }
 0x333   :  { %676 = vsyncpa [#allocation5], 1 }

</bundles_post_ra>
